<compile_context>
chip_gen: v6e
topology: v6e:2x2x1
jax: 0.10.0
libtpu: 0.0.40
codegen_flags: <defaults>
</compile_context>

<pallas_src>
import jax
import jax.numpy as jnp
from jax.experimental import pallas as pl
from jax.experimental.pallas import tpu as pltpu

EPS = 1e-5          # BatchNorm3d default eps
ROW_TILE = 512      # row tile for the mem-bound elementwise / 1x1-conv kernels


def _cparams(sem, vmem_bytes):
    """CompilerParams with a vmem limit derived from the actual block bytes."""
    limit = int(min(max(vmem_bytes + (4 << 20), 32 << 20), 128 << 20))
    return pltpu.CompilerParams(dimension_semantics=sem,
                                vmem_limit_bytes=limit)


def _row_tiling(M, cap=ROW_TILE):
    """Pick a row tile (multiple of 8, dividing M when possible) -> (tm, Mp)."""
    if M <= cap:
        return M, M
    t = cap - cap % 8
    while t >= 8:
        if M % t == 0:
            return t, M
        t -= 8
    tm = cap
    return tm, ((M + tm - 1) // tm) * tm


# --------------------------------------------------------------------------
# ConvTranspose3d, kernel_size=2, stride=2 (no overlap -> one dot per plane)
# --------------------------------------------------------------------------

def _upconv_k2s2_kernel(x_ref, w_ref, b_ref, o_ref):
    # x_ref: (1, 1, H*W, Cin) f32    w_ref: (Cin, 8*Cout) bf16 (kd,kh,kw,co cols)
    # b_ref: (1, 8*Cout) f32         o_ref: (1, 1, H*W, 8*Cout) f32 (lane-dense)
    y = jnp.dot(x_ref[0, 0].astype(jnp.bfloat16), w_ref[...],
                preferred_element_type=jnp.float32) + b_ref[...]
    o_ref[0, 0] = y.astype(o_ref.dtype)


def conv_transpose3d_k2s2(x, w8, b8):
    """ConvTranspose3d(k=2, s=2).  x: (N, D, H, W, Cin) NDHWC.
    w8: (Cin, 8*Cout) bf16, columns ordered (kd, kh, kw, co).  b8: (1, 8*Cout)."""
    N, D, H, W, Cin = x.shape
    Cout = w8.shape[1] // 8
    x3 = x.reshape(N, D, H * W, Cin)
    blk = (H * W * Cin + H * W * 8 * Cout + b8.size) * 4 + w8.size * 2
    out = pl.pallas_call(
        _upconv_k2s2_kernel,
        out_shape=jax.ShapeDtypeStruct((N, D, H * W, 8 * Cout), jnp.float32),
        grid=(N, D),
        in_specs=[
            pl.BlockSpec((1, 1, H * W, Cin), lambda n, d: (n, d, 0, 0)),
            pl.BlockSpec((Cin, 8 * Cout), lambda n, d: (0, 0)),
            pl.BlockSpec((1, 8 * Cout), lambda n, d: (0, 0)),
        ],
        out_specs=pl.BlockSpec((1, 1, H * W, 8 * Cout),
                               lambda n, d: (n, d, 0, 0)),
        compiler_params=_cparams(("parallel", "parallel"), 2 * blk),
    )(x3, w8, b8)
    # One wrapper-side XLA transpose does the 2x2x2 interleave (kernel stays
    # lane-dense; no in-kernel sublane->lane relayout).
    out = out.reshape(N, D, H, W, 2, 2, 2, Cout)
    out = jnp.transpose(out, (0, 1, 4, 2, 5, 3, 6, 7))
    return out.reshape(N, 2 * D, 2 * H, 2 * W, Cout)


# --------------------------------------------------------------------------
# Conv3d 3x3x3, padding=1, dense resident weight, optional fused relu(BN(.))
# --------------------------------------------------------------------------

def _pad_flatten(x):
    """(N, D, H, W, C) -> zero-padded, plane-flattened (N, D+2, (H+3)*(W+2), C).
    H gets one extra bottom zero row so the largest tap offset (2*(W+2)+2)
    plus the H*(W+2) accumulator rows stays in bounds."""
    N, D, H, W, C = x.shape
    xp = jnp.pad(x, ((0, 0), (1, 1), (1, 2), (1, 1), (0, 0)))
    return xp.reshape(N, D + 2, (H + 3) * (W + 2), C)


def _interior_row_mask(H, W):
    hp = jnp.arange(H + 3)
    wp = jnp.arange(W + 2)
    m = ((hp >= 1) & (hp <= H))[:, None] & ((wp >= 1) & (wp <= W))[None, :]
    return m.astype(jnp.float32).reshape((H + 3) * (W + 2), 1)


def _make_conv3x3x3_kernel(H, W, fuse_bn_relu):
    Wp = W + 2
    Macc = H * Wp

    def kernel(x0_ref, x1_ref, x2_ref, sc_ref, sh_ref, mask_ref,
               w_ref, b_ref, o_ref, acc_ref):
        # x*_ref : (1, 1, R, Cin) padded planes at padded-depth d, d+1, d+2
        # sc/sh  : (1, Cin) f32 input-BN scale/shift (only read when fused)
        # mask   : (R, 1) f32 interior-row mask
        # w_ref  : (3, 3, 3, Cin, Cout) bf16 (constant index -> fetched once)
        # b_ref  : (1, Cout) f32
        # o_ref  : (1, 1, H*W, Cout) f32
        # acc_ref: (H*(W+2), Cout) f32 VMEM scratch (junk halo cols never read)
        d = pl.program_id(1)
        D = pl.num_programs(1)
        acc_ref[...] = jnp.broadcast_to(b_ref[...], acc_ref.shape)
        planes = (x0_ref, x1_ref, x2_ref)
        for kd in range(3):
            x = planes[kd][0, 0]                               # (R, Cin) f32
            if fuse_bn_relu:
                # relu(bn(x)) on interior rows, exact 0 on the halo (row mask
                # handles the H/W border, validf the two depth-halo planes).
                validf = jnp.logical_and(d + kd >= 1,
                                         d + kd <= D).astype(jnp.float32)
                x = (mask_ref[...] * validf *
                     jnp.maximum(x * sc_ref[...] + sh_ref[...], 0.0))
            xb = x.astype(jnp.bfloat16)                        # bf16 MXU operand
            for kh in range(3):
                for kw in range(3):
                    off = kh * Wp + kw
                    acc_ref[...] += jnp.dot(
                        xb[off:off + Macc, :], w_ref[kd, kh, kw],
                        preferred_element_type=jnp.float32)
        # Drop the 2 junk columns per h row-group while storing.
        for h in range(H):
            o_ref[0, 0, h * W:(h + 1) * W, :] = acc_ref[h * Wp:h * Wp + W, :]

    return kernel


def conv3d_3x3x3(xp, w, b, H, W, bn_scale=None, bn_shift=None):
    """Conv3d k=3 p=1 on a padded, plane-flattened input.

    xp: (N, D+2, R, Cin) with R = (H+3)*(W+2)  (from _pad_flatten)
    w : (3, 3, 3, Cin, Cout) bf16      b: (1, Cout) f32
    bn_scale / bn_shift: optional (1, Cin) f32 -- if given, relu(bn(.)) of the
      raw input is fused into the conv's load path (halo stays exactly 0).
    Returns the raw conv output, shape (N, D, H*W, Cout) f32.
    """
    N, Dp, R, Cin = xp.shape
    D = Dp - 2
    Cout = w.shape[-1]
    fuse = bn_scale is not None
    if not fuse:
        bn_scale = jnp.ones((1, Cin), jnp.float32)
        bn_shift = jnp.zeros((1, Cin), jnp.float32)
    mask = _interior_row_mask(H, W)
    kernel = _make_conv3x3x3_kernel(H, W, fuse)

    def plane_spec(off):
        return pl.BlockSpec((1, 1, R, Cin), lambda n, d: (n, d + off, 0, 0))

    blk = (3 * R * Cin + 2 * Cin + R + Cout + H * W * Cout) * 4 + w.size * 2
    scratch = H * (W + 2) * Cout * 4
    # TODO(synk): depth-window blocking (TD planes per step) would cut the 3x
    # activation halo re-read to (TD+2)/TD; pipeline_mode=pl.Buffered(1) on the
    # constant-index operands would drop their second VMEM buffer; the BN stats
    # accumulation could also be fused into this kernel's epilogue.
    return pl.pallas_call(
        kernel,
        out_shape=jax.ShapeDtypeStruct((N, D, H * W, Cout), jnp.float32),
        grid=(N, D),
        in_specs=[
            plane_spec(0), plane_spec(1), plane_spec(2),
            pl.BlockSpec((1, Cin), lambda n, d: (0, 0)),
            pl.BlockSpec((1, Cin), lambda n, d: (0, 0)),
            pl.BlockSpec((R, 1), lambda n, d: (0, 0)),
            pl.BlockSpec((3, 3, 3, Cin, Cout), lambda n, d: (0, 0, 0, 0, 0)),
            pl.BlockSpec((1, Cout), lambda n, d: (0, 0)),
        ],
        out_specs=pl.BlockSpec((1, 1, H * W, Cout), lambda n, d: (n, d, 0, 0)),
        scratch_shapes=[pltpu.VMEM((H * (W + 2), Cout), jnp.float32)],
        compiler_params=_cparams(("parallel", "parallel"), 2 * blk + scratch),
    )(xp, xp, xp, bn_scale, bn_shift, mask, w, b)


# --------------------------------------------------------------------------
# Two-pass training-mode BatchNorm3d (+ ReLU, optionally fused with 1x1 conv)
# --------------------------------------------------------------------------

def _bn_stats_kernel(x_ref, o_ref, acc_ref):
    # x_ref: (tm, C); o_ref: (1, 2, C); acc_ref: (2, C) = [sum; sumsq]
    i = pl.program_id(1)

    @pl.when(i == 0)
    def _():
        acc_ref[...] = jnp.zeros_like(acc_ref)

    x = x_ref[...]
    stacked = jnp.concatenate([jnp.sum(x, axis=0, keepdims=True),
                               jnp.sum(x * x, axis=0, keepdims=True)], axis=0)
    acc_ref[...] = acc_ref[...] + stacked          # single full-tile update

    @pl.when(i == pl.num_programs(1) - 1)
    def _():
        o_ref[0] = acc_ref[...]


def batchnorm_stats(x2):
    """x2: (M, C) f32 -> (2, C) = [per-channel sum; per-channel sumsq]."""
    M, C = x2.shape
    tm, Mp = _row_tiling(M)
    if Mp != M:
        x2 = jnp.pad(x2, ((0, Mp - M), (0, 0)))    # zero rows: sums unchanged
    nt = Mp // tm
    P = 2 if (nt % 2 == 0 and nt >= 2) else 1      # leading parallel axis (v7x)
    npp = nt // P
    blk = (tm * C + 2 * C) * 4
    part = pl.pallas_call(
        _bn_stats_kernel,
        out_shape=jax.ShapeDtypeStruct((P, 2, C), jnp.float32),
        grid=(P, npp),
        in_specs=[pl.BlockSpec((tm, C), lambda p, i: (p * npp + i, 0))],
        out_specs=pl.BlockSpec((1, 2, C), lambda p, i: (p, 0, 0)),
        scratch_shapes=[pltpu.VMEM((2, C), jnp.float32)],
        compiler_params=_cparams(("parallel", "arbitrary"), 2 * blk + 2 * C * 4),
    )(x2)
    return jnp.sum(part, axis=0)


def _bn_scale_shift(sums, gamma, beta, count):
    mean = sums[0] / count
    var = jnp.maximum(sums[1] / count - mean * mean, 0.0)   # biased batch var
    scale = gamma * jax.lax.rsqrt(var + EPS)
    shift = beta - mean * scale
    return scale.reshape(1, -1), shift.reshape(1, -1)


def _bn_relu_kernel(x_ref, sc_ref, sh_ref, o_ref):
    o_ref[...] = jnp.maximum(x_ref[...] * sc_ref[...] + sh_ref[...], 0.0)


def batchnorm_relu_apply(x2, sc, sh):
    """Standalone relu(bn(.)) (only used on the last_layer=False path)."""
    M, C = x2.shape
    tm, Mp = _row_tiling(M)
    x2p = jnp.pad(x2, ((0, Mp - M), (0, 0))) if Mp != M else x2
    blk = (2 * tm * C + 2 * C) * 4
    y = pl.pallas_call(
        _bn_relu_kernel,
        out_shape=jax.ShapeDtypeStruct((Mp, C), jnp.float32),
        grid=(Mp // tm,),
        in_specs=[pl.BlockSpec((tm, C), lambda i: (i, 0)),
                  pl.BlockSpec((1, C), lambda i: (0, 0)),
                  pl.BlockSpec((1, C), lambda i: (0, 0))],
        out_specs=pl.BlockSpec((tm, C), lambda i: (i, 0)),
        compiler_params=_cparams(("parallel",), 2 * blk),
    )(x2p, sc, sh)
    return y[:M]


def _bn_relu_conv1x1_kernel(x_ref, sc_ref, sh_ref, w_ref, b_ref, o_ref):
    y = jnp.maximum(x_ref[...] * sc_ref[...] + sh_ref[...], 0.0)
    o_ref[...] = (jnp.dot(y.astype(jnp.bfloat16), w_ref[...],
                          preferred_element_type=jnp.float32)
                  + b_ref[...]).astype(o_ref.dtype)


def batchnorm_relu_conv1x1(x2, sc, sh, w, b):
    """Fused relu(bn(.)) + Conv3d(k=1).  x2: (M, C); w: (C, ncls) bf16."""
    M, C = x2.shape
    ncls = w.shape[1]
    tm, Mp = _row_tiling(M)
    x2p = jnp.pad(x2, ((0, Mp - M), (0, 0))) if Mp != M else x2
    blk = (tm * C + 2 * C + ncls + tm * ncls) * 4 + w.size * 2
    # Output lane width is just ncls (small final tensor); padding it to 128
    # lanes would multiply the HBM writes, so the masked store is kept.
    y = pl.pallas_call(
        _bn_relu_conv1x1_kernel,
        out_shape=jax.ShapeDtypeStruct((Mp, ncls), jnp.float32),
        grid=(Mp // tm,),
        in_specs=[pl.BlockSpec((tm, C), lambda i: (i, 0)),
                  pl.BlockSpec((1, C), lambda i: (0, 0)),
                  pl.BlockSpec((1, C), lambda i: (0, 0)),
                  pl.BlockSpec((C, ncls), lambda i: (0, 0)),
                  pl.BlockSpec((1, ncls), lambda i: (0, 0))],
        out_specs=pl.BlockSpec((tm, ncls), lambda i: (i, 0)),
        compiler_params=_cparams(("parallel",), 2 * blk),
    )(x2p, sc, sh, w, b)
    return y[:M]


# ------------------------------- JAX glue -----------------------------------

def _resize_axis_linear(x, axis, out_len):
    in_len = x.shape[axis]
    if in_len == out_len:
        return x
    scale = in_len / out_len
    src = (jnp.arange(out_len, dtype=jnp.float32) + 0.5) * scale - 0.5
    src = jnp.clip(src, 0.0, in_len - 1)
    i0 = jnp.floor(src).astype(jnp.int32)
    i1 = jnp.minimum(i0 + 1, in_len - 1)
    w1 = src - i0.astype(jnp.float32)
    x0 = jnp.take(x, i0, axis=axis)
    x1 = jnp.take(x, i1, axis=axis)
    shp = [1] * x.ndim
    shp[axis] = out_len
    return x0 * (1.0 - w1.reshape(shp)) + x1 * w1.reshape(shp)


def trilinear_resize(x, size):
    # F.interpolate(mode='trilinear', align_corners=False) semantics.
    # TODO(synk): no clean Pallas equivalent for a generic gather-based resize;
    # it is an identity when the sizes already match (the usual decoder case).
    for ax, s in zip((1, 2, 3), size):
        x = _resize_axis_linear(x, ax, s)
    return x


def init_params(key, in_channels, res_channels, num_classes):
    mid = in_channels // 2
    ks = jax.random.split(key, 10)

    def rnd(k, shape):
        return 0.1 * jax.random.normal(k, shape, dtype=jnp.float32)

    return {
        "up_w": rnd(ks[0], (in_channels, in_channels, 2, 2, 2)),
        "up_b": rnd(ks[1], (in_channels,)),
        "conv1_w": rnd(ks[2], (mid, res_channels + in_channels, 3, 3, 3)),
        "conv1_b": rnd(ks[3], (mid,)),
        "conv2_w": rnd(ks[4], (mid, mid, 3, 3, 3)),
        "conv2_b": rnd(ks[5], (mid,)),
        "bn_gamma": 1.0 + rnd(ks[6], (mid,)),
        "bn_beta": rnd(ks[7], (mid,)),
        "conv3_w": rnd(ks[8], (num_classes, mid, 1, 1, 1)),
        "conv3_b": rnd(ks[9], (num_classes,)),
    }


def prepare_params(params):
    """One-time conversion of PyTorch-layout params into kernel-ready tensors
    (transposes / reshapes / bf16 casts hoisted out of the per-call path)."""
    Cin = params["up_w"].shape[0]
    Cup = params["up_w"].shape[1]
    up_w8 = jnp.transpose(params["up_w"], (0, 2, 3, 4, 1)).reshape(
        Cin, 8 * Cup).astype(jnp.bfloat16)                     # (kd,kh,kw,co)
    up_b8 = jnp.tile(params["up_b"], 8).reshape(1, 8 * Cup).astype(jnp.float32)

    def conv_w(w):   # PyTorch (Cout, Cin, 3,3,3) -> (3,3,3,Cin,Cout) bf16
        return jnp.transpose(w, (2, 3, 4, 1, 0)).astype(jnp.bfloat16)

    ncls, mid = params["conv3_w"].shape[0], params["conv1_w"].shape[0]
    return {
        "up_w8": up_w8, "up_b8": up_b8,
        "conv1_w": conv_w(params["conv1_w"]),
        "conv1_b": params["conv1_b"].reshape(1, -1).astype(jnp.float32),
        "conv2_w": conv_w(params["conv2_w"]),
        "conv2_b": params["conv2_b"].reshape(1, -1).astype(jnp.float32),
        "bn_gamma": params["bn_gamma"].astype(jnp.float32),
        "bn_beta": params["bn_beta"].astype(jnp.float32),
        "conv3_w": params["conv3_w"].reshape(ncls, mid).T.astype(jnp.bfloat16),
        "conv3_b": params["conv3_b"].reshape(1, -1).astype(jnp.float32),
    }


def upconv3d_block(prep, x_ncdhw, skip_ncdhw=None, last_layer=True):
    """Forward pass of UpConv3dBlock (training-mode BN).  NCDHW in/out."""
    x = jnp.transpose(x_ncdhw, (0, 2, 3, 4, 1))                  # -> NDHWC
    x = conv_transpose3d_k2s2(x, prep["up_w8"], prep["up_b8"])
    if skip_ncdhw is not None:
        skip = jnp.transpose(skip_ncdhw, (0, 2, 3, 4, 1))
        x = trilinear_resize(x, skip.shape[1:4])
        x = jnp.concatenate([x, skip], axis=-1)
    N, D, H, W, _ = x.shape
    mid = prep["conv1_w"].shape[-1]
    gamma, beta = prep["bn_gamma"], prep["bn_beta"]
    count = float(N * D * H * W)
    M = N * D * H * W

    # conv1 (3x3x3, pad 1) on the padded / plane-flattened concat input.
    # TODO(synk): the zero-pad (and the concat above) are still wrapper-side
    # XLA passes; a split-K conv1 with in-kernel halo build would fold them in.
    h1 = conv3d_3x3x3(_pad_flatten(x), prep["conv1_w"], prep["conv1_b"], H, W)

    # BN1 batch statistics; relu(bn1(.)) is then fused into conv2's load path.
    sums1 = batchnorm_stats(h1.reshape(M, mid))
    sc1, sh1 = _bn_scale_shift(sums1, gamma, beta, count)

    h1p = _pad_flatten(h1.reshape(N, D, H, W, mid))
    h2 = conv3d_3x3x3(h1p, prep["conv2_w"], prep["conv2_b"], H, W,
                      bn_scale=sc1, bn_shift=sh1)

    # BN2 (same gamma/beta module, fresh batch stats). Running stats untracked.
    sums2 = batchnorm_stats(h2.reshape(M, mid))
    sc2, sh2 = _bn_scale_shift(sums2, gamma, beta, count)

    if last_layer:
        y = batchnorm_relu_conv1x1(h2.reshape(M, mid), sc2, sh2,
                                   prep["conv3_w"], prep["conv3_b"])
        y = y.reshape(N, D, H, W, prep["conv3_w"].shape[1])
    else:
        y = batchnorm_relu_apply(h2.reshape(M, mid), sc2, sh2)
        y = y.reshape(N, D, H, W, mid)
    return jnp.transpose(y, (0, 4, 1, 2, 3))                     # -> NCDHW


if __name__ == "__main__":
    in_channels, res_channels, num_classes = 8, 4, 3
    key = jax.random.PRNGKey(0)
    kx, ks, kp = jax.random.split(key, 3)

    x = jax.random.normal(kx, (2, in_channels, 4, 4, 4), dtype=jnp.float32)
    skip = jax.random.normal(ks, (2, res_channels, 8, 8, 8), dtype=jnp.float32)
    params = init_params(kp, in_channels, res_channels, num_classes)
    prep = prepare_params(params)

    out = upconv3d_block(prep, x, skip, last_layer=True)
    out = jax.block_until_ready(out)
    assert out.shape == (2, num_classes, 8, 8, 8), out.shape
    assert bool(jnp.all(jnp.isfinite(out)))
    print("KERNEL_OK")
</pallas_src>

<mosaic_0001>
module attributes {stable_mosaic.version = 11 : i64} {
  func.func @_upconv_k2s2_kernel(%arg0: i32, %arg1: i32, %arg2: memref<1x1x16x8xf32, #tpu.memory_space<vmem>>, %arg3: memref<8x64xbf16, #tpu.memory_space<vmem>>, %arg4: memref<1x64xf32, #tpu.memory_space<vmem>>, %arg5: memref<1x1x16x64xf32, #tpu.memory_space<vmem>>) attributes {dimension_semantics = [#tpu.dimension_semantics<parallel>, #tpu.dimension_semantics<parallel>], iteration_bounds = array<i64: 2, 4>, scalar_prefetch = 0 : i64, scratch_operands = 0 : i64, tpu.core_type = #tpu.core_type<tc>, window_params = [{transform_indices = @transform_0, window_bounds = array<i64: 1, 1, 16, 8>}, {pipeline_mode = #tpu.pipeline_mode<synchronous>, transform_indices = @transform_1, window_bounds = array<i64: 8, 64>}, {pipeline_mode = #tpu.pipeline_mode<synchronous>, transform_indices = @transform_2, window_bounds = array<i64: 1, 64>}, {transform_indices = @transform_3, window_bounds = array<i64: 1, 1, 16, 64>}]} {
    %c0 = arith.constant 0 : index
    %c0_0 = arith.constant 0 : index
    %c0_1 = arith.constant 0 : index
    %c0_2 = arith.constant 0 : index
    %0 = vector.load %arg2[%c0, %c0_0, %c0_1, %c0_2] : memref<1x1x16x8xf32, #tpu.memory_space<vmem>>, vector<1x1x16x8xf32>
    %1 = vector.shape_cast %0 : vector<1x1x16x8xf32> to vector<16x8xf32>
    %2 = arith.truncf %1 : vector<16x8xf32> to vector<16x8xbf16>
    %c0_3 = arith.constant 0 : index
    %c0_4 = arith.constant 0 : index
    %3 = vector.load %arg3[%c0_3, %c0_4] : memref<8x64xbf16, #tpu.memory_space<vmem>>, vector<8x64xbf16>
    %cst = arith.constant dense<0.000000e+00> : vector<16x64xf32>
    %4 = tpu.matmul %2, %3, %cst {dimension_numbers = #tpu.dot_dimension_numbers<[1], [0], [0], [1], [0, 0, 1, 1], [], []>} : vector<16x8xbf16>, vector<8x64xbf16>, vector<16x64xf32> -> vector<16x64xf32>
    %c0_5 = arith.constant 0 : index
    %c0_6 = arith.constant 0 : index
    %5 = vector.load %arg4[%c0_5, %c0_6] : memref<1x64xf32, #tpu.memory_space<vmem>>, vector<1x64xf32>
    %6 = vector.broadcast %5 : vector<1x64xf32> to vector<16x64xf32>
    %7 = arith.addf %4, %6 : vector<16x64xf32>
    %c0_7 = arith.constant 0 : index
    %c0_8 = arith.constant 0 : index
    %c0_9 = arith.constant 0 : index
    %c0_10 = arith.constant 0 : index
    %8 = vector.load %arg5[%c0_7, %c0_8, %c0_9, %c0_10] : memref<1x1x16x64xf32, #tpu.memory_space<vmem>>, vector<1x1x16x64xf32>
    %9 = vector.shape_cast %8 : vector<1x1x16x64xf32> to vector<16x64xf32>
    %10 = vector.shape_cast %7 : vector<16x64xf32> to vector<1x1x16x64xf32>
    tpu.vector_store %arg5[%c0_7, %c0_8, %c0_9, %c0_10], %10 {strides = array<i32>} : memref<1x1x16x64xf32, #tpu.memory_space<vmem>>, vector<1x1x16x64xf32>,
    return
  }
  func.func @transform_0(%arg0: i32, %arg1: i32) -> (i32, i32, i32, i32) {
    %c0_i32 = arith.constant 0 : i32
    %c0_i32_0 = arith.constant 0 : i32
    %c0_i32_1 = arith.constant 0 : i32
    return %arg0, %arg1, %c0_i32, %c0_i32_0 : i32, i32, i32, i32
  }
  func.func @transform_1(%arg0: i32, %arg1: i32) -> (i32, i32) {
    %c0_i32 = arith.constant 0 : i32
    %c0_i32_0 = arith.constant 0 : i32
    %c0_i32_1 = arith.constant 0 : i32
    return %c0_i32, %c0_i32_0 : i32, i32
  }
  func.func @transform_2(%arg0: i32, %arg1: i32) -> (i32, i32) {
    %c0_i32 = arith.constant 0 : i32
    %c0_i32_0 = arith.constant 0 : i32
    %c0_i32_1 = arith.constant 0 : i32
    return %c0_i32, %c0_i32_0 : i32, i32
  }
  func.func @transform_3(%arg0: i32, %arg1: i32) -> (i32, i32, i32, i32) {
    %c0_i32 = arith.constant 0 : i32
    %c0_i32_0 = arith.constant 0 : i32
    %c0_i32_1 = arith.constant 0 : i32
    return %arg0, %arg1, %c0_i32, %c0_i32_0 : i32, i32, i32, i32
  }
}

</mosaic_0001>

<bundles_post_ra>
// kernel: tpu_custom_call.1
= control target key start
LH: loop header
LB: loop body
LE: loop exit
PB: predicated region body
PF: predicated region fallthrough
CT: control target
= control target key end

     0   :  { %s726_s0 = inlined_call_operand.vmem [shape: f32[2,4,16,8], index: 0, kind: input, shape index: {}]   ;;  %s727_s1 = inlined_call_operand.vmem [shape: bf16[8,64], index: 1, kind: input, shape index: {}]   ;;  %s728_s2 = inlined_call_operand.vmem [shape: f32[1,64], index: 2, kind: input, shape index: {}]   ;;  %s729_s3 = inlined_call_operand.hbm [shape: f32[2,4,16,64], index: 3, kind: output, shape index: {}]  }
   0x1   :  { %730 = sst [smem:[#allocation5_spill]] %s727_s1 }
   0x2   :  { %8 = vsyncpa [#allocation3], 0 }
   0x3   :  { %10 = vsyncpa [#allocation3 + $0x1], 0  ;;  %s581_s12 = smov 0   ;;  %s583_s13 = smov 0  }
   0x4   :  { %s585_s14 = smov 0   ;;  %s587_s15 = smov 0  }
   0x5   :  { %s589_s16 = smov 0   ;;  %s591_s17 = smov 0  }
   0x6   :  { %s593_s18 = smov 0   ;;  %s595_s19 = smov 0  }
   0x7 LB: > { %s362_s20 = sadd.s32 4294967295, %s554_s19   ;;  %s363_s21 = sadd.s32 4294967294, %s554_s19   ;;  %s554_s19 = sphi %s595_s19, %s16_s19   ;;  %s550_s18 = sphi %s593_s18, %s740_s18   ;;  %s546_s17 = sphi %s591_s17, %s739_s17   ;;  %s542_s16 = sphi %s589_s16, %s738_s16   ;;  %s538_s15 = sphi %s587_s15, %s737_s15   ;;  %s534_s14 = sphi %s585_s14, %s736_s14   ;;  %s530_s13 = sphi %s583_s13, %s735_s13   ;;  %s526_s12 = sphi %s581_s12, %s734_s12  }
   0x8   : > { %s25_s22 = sadd.s32 1, %s546_s17  ;;  %s28_s23 = sadd.s32 1, %s550_s18 }
   0x9   : > { %p26_p0 = scmp.ge.s32.totalorder %s25_s22, 4  ;;  %p117_p1 = scmp.ne.s32.totalorder %s534_s14, %s530_s13 }
   0xa   : > { %p118_p2 = scmp.eq.s32.totalorder %s362_s20, 7  ;;  %p123_p5 = scmp.ne.s32.totalorder %s530_s13, %s526_s12 }
   0xb   : > { %s742_s22 = smov (%p26_p0, %s25_s22), 0  ;;  %s744_s23 = smov (!%p26_p0, %s28_s23), %s550_s18 }
   0xc   : > { %s103_s24 = ssub.s32 %s546_s17, %s742_s22  ;;  %p632_p3 = por %p118_p2, %p117_p1 }
   0xd   : > { %p30_p4 = scmp.ge.s32.totalorder %s744_s23, 2  ;;  %p124_p6 = scmp.eq.s32.totalorder %s363_s21, 7 }
   0xe   : > { %p366_p7 = scmp.ge.s32.totalorder %s554_s19, 1  ;;  %p160_p9 = scmp.lt.s32.totalorder %s554_s19, 9 }
   0xf   : > { %s746_s23 = smov (%p30_p4, %s744_s23), 0  ;;  %p641_p8 = por %p124_p6, %p123_p5 }
  0x10   : > { %s102_s27 = ssub.s32 %s550_s18, %s746_s23  ;;  %s107_s28 = sadd.s32 1, %s534_s14 }
  0x11   : > { %s104_s29 = sor.u32 %s103_s24, %s102_s27  ;;  %p161_p10 = pnand %p366_p7, %p160_p9 }
  0x12   : > { %p105_p11 = scmp.eq.s32.totalorder %s104_s29, 0  ;;  %s733_s1 = sld [smem:[#allocation5_spill]] (!%p161_p10) }
  0x13   : > { %164 = sbr.rel (%p161_p10) target bundleno = 247 (0xf7), region = 32  ;;  %p188_p12 = scmp.lt.s32.totalorder (!%p161_p10), %s542_s16, 1 }
  0x14   : > { %s650_s30 = scalar_select %p105_p11, %s534_s14, %s107_s28  }
  0x15   : > { %p190_p13 = scmp.lt.s32.totalorder (!%p161_p10), %s538_s15, 3  ;;  %s185_s27 = sand.u32 (!%p161_p10), 1, %s530_s13  }
  0x16   : > { %s374_s28 = sshll.u32 (!%p161_p10), %s538_s15, 1  ;;  %s375_s29 = sshll.u32 (!%p161_p10), %s542_s16, 3 }
  0x17   : > { %s367_s4 = sshll.u32 (!%p161_p10), %s185_s27, 4  ;;  %s558_s20 = smov (!%p161_p10), [#allocation2]  }
  0x18   : > { %v201_v0 = vld [vmem:[%s733_s1] sm:$0xf]  ;;  %vm213_vm0 = vcmask 1043456   ;;  %v556_v1 = vmov 0.0   ;;  %vm557_vm1 = vmmov 0   ;;  %s189_s6 = scalar_select %p188_p12, %s542_s16, 1 }
  0x19   : > { %381 = vmatprep.subr.bf16.mxu0 %v556_v1  ;;  %v215_v2 = vsel %vm213_vm0, %v201_v0, 0  ;;  %383 = vmatprep.mubr.msk.bf16.mxu0 %vm557_vm1, %v556_v1  ;;  %s191_s7 = scalar_select %p190_p13, %s538_s15, 3  ;;  %vm209_vm2 = vcmask 64512   ;;  %v371_v6 = vld [vmem:[%s728_s2] ss:$0 sm:$0xff]  ;;  %vm258_vm3 = vcmask 523264  }
  0x1a   : > { %382 = vmatpush3.bf16.msra.mxu0 %v215_v2  ;;  %s369_s8 = sshll.u32 %s189_s6, 3  ;;  %s274_s6 = sadd.s32 %s375_s29, %s374_s28 }
  0x1b   : > { %s368_s9 = sshll.u32 %s191_s7, 1  ;;  %s187_s7 = scalar_lea.vmem [#allocation2], %s367_s4 }
  0x1c   : > { %s194_s10 = sadd.s32 %s369_s8, %s368_s9  ;;  %s277_s8 = sshll.u32 %s187_s7, 4  ;;  %s668_s8 = int_to_ptr.vmem [resolvable:$true] %s277_s8 }
  0x1d   : > { %s370_s11 = sshll.u32 %s194_s10, 3  ;;  %s376_s9 = sshll.u32 %s274_s6, 7 }
  0x1e   : > { %s196_s24 = scalar_lea.vmem %s726_s0, %s370_s11  ;;  %s673_s16 = scalar_lea.hbm %s729_s3, %s376_s9 }
  0x1f   : > { %v198_v3 = vld [vmem:[%s196_s24] sm:$0xff]  ;;  %v199_v4 = vld [vmem:[%s196_s24 + $0x8] sm:$0xff]  ;;  %s675_s10 = scalar_lea.sflag [#allocation3], %s185_s27  ;;  %s462_s11 = scalar_lea.vmem %s668_s8, 256 }
  0x20   : > { %v200_v5 = vpack.c.bf16 %v199_v4, %v198_v3  ;;  %p463_p0 = scmp.ne.s32.totalorder %s668_s8, %s462_s11  ;;  %s466_s21 = sshll.u32 %s558_s20, 4  ;;  %s467_s21 = int_to_ptr.vmem [resolvable:$false] %s466_s21 }
  0x21   : > { %s468_s24 = scalar_lea.vmem %s467_s21, 512  ;;  %p469_p4 = scmp.lt.s32.totalorder %s668_s8, %s467_s21 }
  0x22   : > { %384 = vmatmul.mubr.msk.bf16.vlgmr.msra.gmra.mxu0 %vm209_vm2, %v200_v5  ;;  %p464_p1 = pnand %p463_p0, %p632_p3  ;;  %p470_p5 = scmp.lt.s32.totalorder %s468_s24, %s462_s11 }
  0x24   : > { %p465_p2 = pneg %p464_p1  ;;  %p471_p6 = por %p470_p5, %p469_p4 }
  0x26   : > { %p472_p7 = pnand %p471_p6, %p465_p2 }
  0xe2   : > { %v251_v7 = vpop.f32.mrf.mxu0 }
  0xe3   : > { %v252_v8 = vadd.f32 %v371_v6, %v251_v7 }
  0xe4   : > { %v385_v9 = vpop.f32.mrf.mxu0 }
  0xe5   : > { %259 = vst.msk [vmem:[%s187_s7] sm:$0xff] %vm258_vm3, %v252_v8 }
  0xe6   : > { %v254_v10 = vpop.f32.mrf.mxu0 }
  0xe7   : > { %v255_v11 = vadd.f32 %v371_v6, %v254_v10 }
  0xe8   : > { %v386_v12 = vpop.f32.mrf.mxu0 }
  0xe9   : > { %260 = vst.msk [vmem:[%s187_s7 + $0x8] sm:$0xff] %vm258_vm3, %v255_v11 }
  0xea   : > { %475 = shalt.err (!%p472_p7)
}
  0xeb   : > { %s476_s27 = scalar_lea.hbm %s673_s16, 256  ;;  %s480_s4 = scalar_lea.hbm %s729_s3, 2048 }
  0xec   : > { %p477_p9 = scmp.ne.s32.totalorder %s673_s16, %s476_s27  ;;  %p481_p12 = scmp.lt.s32.totalorder %s673_s16, %s729_s3 }
  0xed   : > { %p482_p13 = scmp.lt.s32.totalorder %s480_s4, %s476_s27 }
  0xee   : > { %p478_p10 = pnand %p477_p9, %p632_p3 }
  0xef   : > { %p483_p0 = por %p482_p13, %p481_p12 }
  0xf0   : > { %p479_p11 = pneg %p478_p10 }
  0xf2   : > { %p484_p1 = pnand %p483_p0, %p479_p11 }
  0xf4   : > { %487 = shalt.err (!%p484_p1)
}
  0xf5   : > { %s559_s7 = smov 128   ;;  %s560_s9 = smov 8  }
  0xf6   : > { %387 = dma.vmem_to_hbm [thread:$0]  (%p632_p3), %s668_s8, 256, %s673_s16, %s675_s10, %s559_s7, %s559_s7, %s560_s9  }
  0xf7 PF: > { %p393_p2 = scmp.ge.s32.totalorder %s554_s19, 2  ;;  %s292_s15 = sand.u32 1, %s526_s12  }
  0xf8   : > { %s293_s1 = scalar_lea.sflag [#allocation3], %s292_s15 }
  0xf9   : > { %p390_p4 = pnand %p393_p2, %p641_p8 }
  0xfb   : > { %p391_p5 = pneg %p390_p4 }
  0xfd   : > { %521 = dma.done.wait (%p391_p5), %s293_s1, 256  }
  0xfe   : > { %523 = vsyncadd (%p391_p5), %s293_s1, 4294967040  ;;  %s16_s19 = sadd.s32 1, %s554_s19   ;;  %s734_s12 = smov %s530_s13 }
  0xff   : > { %p13_p6 = scmp.ge.s32.totalorder %s16_s19, 10   ;;  %s735_s13 = smov %s534_s14 }
 0x100   : > { %s736_s14 = smov %s650_s30  ;;  %s737_s15 = smov %s546_s17 }
 0x101   : > { %s738_s16 = smov %s550_s18  ;;  %s739_s17 = smov %s742_s22 }
 0x102   : > { %s740_s18 = smov %s746_s23  ;;  %15 = sbr.rel (!%p13_p6) target bundleno = 7 (0x7), region = 67 }
 0x107   :  { %298 = vsyncpa [#allocation3], 1 }
 0x108   :  { %300 = vsyncpa [#allocation3 + $0x1], 1 }

</bundles_post_ra>
